<compile_context>
chip_gen: v7x
topology: tpu7x:2x2x1
jax: 0.10.0
libtpu: 0.0.40
codegen_flags: <defaults>
</compile_context>

<pallas_src>
from functools import partial

import jax
import jax.numpy as jnp
from jax.experimental import pallas as pl
from jax.experimental.pallas import tpu as pltpu

IMAGENET_MEAN = jnp.array([0.485, 0.456, 0.406], dtype=jnp.float32)
IMAGENET_STD = jnp.array([0.229, 0.224, 0.225], dtype=jnp.float32)


def _round_up(x, m):
    return (x + m - 1) // m * m


# ----------------------------------------------------------------------------
# Glue: patchify + MFViT frequency preprocessing
# ----------------------------------------------------------------------------
def patchify_image(img, patch_size, stride):
    """img: (B, C, H, W) -> (B, L, C, kh, kw), same ordering as torch unfold."""
    kh, kw = patch_size
    dh, dw = stride
    B, C, H, W = img.shape
    nh = (H - kh) // dh + 1
    nw = (W - kw) // dw + 1
    patches = []
    for i in range(nh):
        for j in range(nw):
            patches.append(img[:, :, i * dh:i * dh + kh, j * dw:j * dw + kw])
    return jnp.stack(patches, axis=1)


def generate_circular_mask(size, radius):
    c = size // 2
    yy, xx = jnp.meshgrid(jnp.arange(size), jnp.arange(size), indexing="ij")
    dist = jnp.sqrt((yy - c) ** 2 + (xx - c) ** 2)
    return (dist <= radius).astype(jnp.float32)


def filter_image_frequencies(x, mask):
    # TODO(synk): exact semantics of the external `filters` module unavailable;
    # this is the standard fftshift / circular-mask low-high split.
    f = jnp.fft.fftshift(jnp.fft.fft2(x), axes=(-2, -1))
    low = jnp.real(jnp.fft.ifft2(jnp.fft.ifftshift(f * mask, axes=(-2, -1))))
    hi = jnp.real(jnp.fft.ifft2(jnp.fft.ifftshift(f * (1.0 - mask), axes=(-2, -1))))
    return low, hi


def imagenet_normalize(t):
    return (t - IMAGENET_MEAN[None, :, None, None]) / IMAGENET_STD[None, :, None, None]


# ----------------------------------------------------------------------------
# Pallas kernel 1: feature projection (the heavy matmul), tiled bf16 MXU
# ----------------------------------------------------------------------------
def _proj_kernel(x_ref, w_ref, o_ref, acc_ref):
    @pl.when(pl.program_id(1) == 0)
    def _():
        acc_ref[...] = jnp.zeros_like(acc_ref)

    acc_ref[...] += jnp.dot(x_ref[...], w_ref[...],
                            preferred_element_type=jnp.float32)

    @pl.when(pl.program_id(1) == pl.num_programs(1) - 1)
    def _():
        o_ref[...] = acc_ref[...].astype(o_ref.dtype)


def feature_projection(flat, w_feat, *, tile_m=256, tile_k=512,
                       out_dtype=jnp.bfloat16):
    """flat: (M, F) -> (M, Dout) = flat @ w_feat as a tiled Pallas matmul."""
    M, F = flat.shape
    d_out = w_feat.shape[1]
    tm = min(tile_m, _round_up(M, 8))
    tk = min(tile_k, _round_up(F, 128))
    m_pad = _round_up(M, tm)
    f_pad = _round_up(F, tk)

    x = jnp.pad(flat.astype(jnp.bfloat16), ((0, m_pad - M), (0, f_pad - F)))
    w = jnp.pad(w_feat.astype(jnp.bfloat16), ((0, f_pad - F), (0, 0)))

    out = pl.pallas_call(
        _proj_kernel,
        out_shape=jax.ShapeDtypeStruct((m_pad, d_out), out_dtype),
        grid=(m_pad // tm, f_pad // tk),
        in_specs=[
            pl.BlockSpec((tm, tk), lambda i, k: (i, k)),
            pl.BlockSpec((tk, d_out), lambda i, k: (k, 0)),
        ],
        out_specs=pl.BlockSpec((tm, d_out), lambda i, k: (i, 0)),
        scratch_shapes=[pltpu.VMEM((tm, d_out), jnp.float32)],
        compiler_params=pltpu.CompilerParams(
            dimension_semantics=("parallel", "arbitrary")),
    )(x, w)
    return out[:M]


def mfvit_features(patches, freq_mask, w_feat):
    """patches: (M, C, P, P), pixels in [0,1] -> (M, cls_vector_dim) bf16."""
    x = patches.astype(jnp.float32)
    low, hi = filter_image_frequencies(x, freq_mask)
    low = jnp.clip(low, 0.0, 1.0)
    hi = jnp.clip(hi, 0.0, 1.0)
    x = imagenet_normalize(x)
    low = imagenet_normalize(low)
    hi = imagenet_normalize(hi)
    # TODO(synk): real backbone is an external VisionTransformer +
    # FrequencyRestorationEstimator; replaced by a deterministic linear
    # projection of the three normalized frequency streams.
    m = x.shape[0]
    flat = jnp.concatenate(
        [x.reshape(m, -1), low.reshape(m, -1), hi.reshape(m, -1)], axis=-1)
    return feature_projection(flat, w_feat)


# ----------------------------------------------------------------------------
# Pallas kernel 2: patches_attention + LayerNorm + cls_head, BT rows per step
# ----------------------------------------------------------------------------
def _spectral_attn_kernel(x_ref, wdots_ref, wv_ref, wout_ref, gamma_ref,
                          beta_ref, wcls_ref, bcls_ref, out_ref,
                          *, n_patches, heads, dim_head, eps):
    e_dim = heads * dim_head
    bt = x_ref.shape[1]
    d = x_ref.shape[2]

    # 0/1 head->lane broadcast matrix (H, E); row h has ones on head-h lanes.
    lane_head = jax.lax.broadcasted_iota(jnp.int32, (heads, e_dim), 1) // dim_head
    head_row = jax.lax.broadcasted_iota(jnp.int32, (heads, e_dim), 0)
    expand = (lane_head == head_row).astype(jnp.float32)            # (H, E)

    # Single flattened slab of all patches in this batch tile: (N*BT, D) bf16.
    x2 = x_ref[...].reshape(n_patches * bt, d)

    # Two full-width bf16 MXU matmuls with f32 accumulation; the learnable
    # patch_aggregator and attention scale are pre-folded into wdots so the
    # "k" half of to_kv never materializes.
    dots = jnp.dot(x2, wdots_ref[...],
                   preferred_element_type=jnp.float32)              # (N*BT, H)
    vals = jnp.dot(x2, wv_ref[...],
                   preferred_element_type=jnp.float32)              # (N*BT, E)
    dots = dots.reshape(n_patches, bt, heads)
    vals = vals.reshape(n_patches, bt, e_dim)

    # Softmax over the patch axis (leading dim -> pure VPU, no cross-lane).
    m = jnp.max(dots, axis=0, keepdims=True)                        # (1, BT, H)
    exps = jnp.exp(dots - m)                                        # (N, BT, H)
    denom = jnp.sum(exps, axis=0)                                   # (BT, H)
    inv = pl.reciprocal(denom, approx=True)
    attn = exps * inv[None]                                         # (N, BT, H)

    # Broadcast per-head weights to dim_head lanes and combine with values.
    attn_e = jnp.dot(attn.reshape(n_patches * bt, heads), expand,
                     preferred_element_type=jnp.float32)            # (N*BT, E)
    o = jnp.sum(attn_e.reshape(n_patches, bt, e_dim) * vals, axis=0)  # (BT, E)

    # to_out: (BT, E) @ (E, D)
    y = jnp.dot(o.astype(jnp.bfloat16), wout_ref[...],
                preferred_element_type=jnp.float32)                 # (BT, D)

    # LayerNorm over D (f32).
    mean = jnp.mean(y, axis=1, keepdims=True)
    var = jnp.mean(jnp.square(y - mean), axis=1, keepdims=True)
    yn = (y - mean) * jax.lax.rsqrt(var + eps)
    yn = yn * gamma_ref[...] + beta_ref[...]

    # cls_head: Linear(D, 1); one (BT, 1) tile written per grid step.
    out_ref[...] = (jnp.sum(yn * wcls_ref[...], axis=1, keepdims=True)
                    + bcls_ref[...])


def patches_attention_norm_cls(x, w_kv, agg, w_out, gamma, beta, w_cls, b_cls,
                               *, heads, dim_head, batch_tile=256, eps=1e-5):
    """x: (B, N, D) patch features -> (B, 1) logits.

    Fuses patches_attention + LayerNorm + cls_head of PatchBasedMFViT.
    """
    B, N, D = x.shape
    E = heads * dim_head
    # Size the batch tile to the real batch (avoid padding a tiny batch out
    # to 256 rows of dead compute), capped at batch_tile.
    bt = min(max(8, _round_up(batch_tile, 8)), _round_up(B, 8))
    b_pad = _round_up(B, bt)

    # Fold the learnable aggregator and attention scale into the key
    # projection (exact algebraic refactoring): dots = x @ w_dots.
    w_k = w_kv[:, :E].reshape(D, heads, dim_head)
    w_dots = jnp.einsum("dhc,hc->dh", w_k, agg) * (dim_head ** -0.5)  # (D, H)
    w_v = w_kv[:, E:]                                                 # (D, E)

    # (N, B_pad, D) bf16 so every grid step reads clean (N, BT, D) slabs.
    xp = jnp.pad(x.astype(jnp.bfloat16).transpose(1, 0, 2),
                 ((0, 0), (0, b_pad - B), (0, 0)))

    kernel = partial(_spectral_attn_kernel, n_patches=N, heads=heads,
                     dim_head=dim_head, eps=eps)
    out = pl.pallas_call(
        kernel,
        out_shape=jax.ShapeDtypeStruct((b_pad, 1), jnp.float32),
        grid=(b_pad // bt,),
        in_specs=[
            pl.BlockSpec((N, bt, D), lambda t: (0, t, 0)),
            pl.BlockSpec((D, heads), lambda t: (0, 0)),
            pl.BlockSpec((D, E), lambda t: (0, 0)),
            pl.BlockSpec((E, D), lambda t: (0, 0)),
            pl.BlockSpec((1, D), lambda t: (0, 0)),
            pl.BlockSpec((1, D), lambda t: (0, 0)),
            pl.BlockSpec((1, D), lambda t: (0, 0)),
            pl.BlockSpec((1, 1), lambda t: (0, 0)),
        ],
        out_specs=pl.BlockSpec((bt, 1), lambda t: (t, 0)),
        compiler_params=pltpu.CompilerParams(
            dimension_semantics=("parallel",)),
    )(xp, w_dots.astype(jnp.bfloat16), w_v.astype(jnp.bfloat16),
      w_out.astype(jnp.bfloat16), gamma, beta, w_cls, b_cls)
    return out[:B]


# ----------------------------------------------------------------------------
# Pure-JAX f32 reference of the attention / norm / cls math
# ----------------------------------------------------------------------------
def _reference_attention(x, w_kv, agg, w_out, gamma, beta, w_cls, b_cls,
                         heads, dim_head, eps=1e-5):
    B, N, D = x.shape
    E = heads * dim_head
    kv = x @ w_kv
    k = kv[..., :E].reshape(B, N, heads, dim_head).transpose(0, 2, 1, 3)
    v = kv[..., E:].reshape(B, N, heads, dim_head).transpose(0, 2, 1, 3)
    aggr = agg[:, None, :]                                   # (H, 1, dh)
    dots = jnp.einsum("hqd,bhnd->bhqn", aggr, k) * dim_head ** -0.5
    attn = jax.nn.softmax(dots, axis=-1)
    o = jnp.einsum("bhqn,bhnd->bhqd", attn, v)
    o = o.transpose(0, 2, 1, 3).reshape(B, 1, E)
    y = (o @ w_out)[:, 0, :]
    mean = y.mean(-1, keepdims=True)
    var = ((y - mean) ** 2).mean(-1, keepdims=True)
    yn = (y - mean) / jnp.sqrt(var + eps) * gamma[0] + beta[0]
    return jnp.sum(yn * w_cls, axis=-1, keepdims=True) + b_cls[0, 0]


# ----------------------------------------------------------------------------
# Full forward_batch of PatchBasedMFViT
# ----------------------------------------------------------------------------
def patch_based_mfvit_forward(x, params, *, img_patch_size, img_patch_stride,
                              heads, dim_head, batch_tile=256):
    B = x.shape[0]
    patches = patchify_image(x, (img_patch_size, img_patch_size),
                             (img_patch_stride, img_patch_stride))  # (B,L,C,P,P)
    L = patches.shape[1]
    flat = patches.reshape((B * L,) + patches.shape[2:])
    feats = mfvit_features(flat, params["freq_mask"], params["w_feat"])
    feats = feats.reshape(B, L, -1)                                  # (B, N, D)
    return patches_attention_norm_cls(
        feats, params["w_kv"], params["agg"], params["w_out"],
        params["gamma"], params["beta"], params["w_cls"], params["b_cls"],
        heads=heads, dim_head=dim_head, batch_tile=batch_tile)


if __name__ == "__main__":
    # Small config consistent with the module's __init__.
    B, C, H, W = 2, 3, 32, 32
    img_patch_size, img_patch_stride = 16, 16
    cls_vector_dim = 32
    num_heads = 4
    attn_embed_dim = 32
    dim_head = attn_embed_dim // num_heads
    masking_radius = 4

    key = jax.random.PRNGKey(0)
    k_x, k_kv, k_agg, k_out, k_cls, k_feat = jax.random.split(key, 6)

    x = jax.random.uniform(k_x, (B, C, H, W), dtype=jnp.float32)   # pixels in [0,1]

    feat_in = 3 * C * img_patch_size * img_patch_size
    params = {
        "freq_mask": generate_circular_mask(img_patch_size, masking_radius),
        # synthetic stand-in for ViT + FrequencyRestorationEstimator
        "w_feat": 0.02 * jax.random.normal(k_feat, (feat_in, cls_vector_dim), jnp.float32),
        # to_kv: Linear(cls_vector_dim, 2*attn_embed_dim, bias=False)
        "w_kv": 0.02 * jax.random.normal(k_kv, (cls_vector_dim, 2 * attn_embed_dim), jnp.float32),
        # patch_aggregator: (heads, 1, dim_head) trunc_normal(0.02); stored squeezed
        "agg": 0.02 * jax.random.normal(k_agg, (num_heads, dim_head), jnp.float32),
        # to_out: Linear(attn_embed_dim, cls_vector_dim, bias=False)
        "w_out": 0.02 * jax.random.normal(k_out, (attn_embed_dim, cls_vector_dim), jnp.float32),
        # LayerNorm(cls_vector_dim): ones / zeros per _init_weights
        "gamma": jnp.ones((1, cls_vector_dim), jnp.float32),
        "beta": jnp.zeros((1, cls_vector_dim), jnp.float32),
        # cls_head: Linear(cls_vector_dim, 1); weight as (1, D), zero bias
        "w_cls": 0.02 * jax.random.normal(k_cls, (1, cls_vector_dim), jnp.float32),
        "b_cls": jnp.zeros((1, 1), jnp.float32),
    }

    out = patch_based_mfvit_forward(
        x, params, img_patch_size=img_patch_size,
        img_patch_stride=img_patch_stride, heads=num_heads, dim_head=dim_head)
    out = jax.block_until_ready(out)
    assert out.shape == (B, 1), out.shape

    # Cross-check the full pipeline against a pure-JAX f32 reference
    # (Pallas path uses bf16 matmuls, hence the relaxed tolerance).
    patches = patchify_image(x, (img_patch_size,) * 2, (img_patch_stride,) * 2)
    L = patches.shape[1]
    flatp = patches.reshape((B * L,) + patches.shape[2:]).astype(jnp.float32)
    low, hi = filter_image_frequencies(flatp, params["freq_mask"])
    low = jnp.clip(low, 0.0, 1.0)
    hi = jnp.clip(hi, 0.0, 1.0)
    xs = imagenet_normalize(flatp)
    low = imagenet_normalize(low)
    hi = imagenet_normalize(hi)
    m = flatp.shape[0]
    flat_ref = jnp.concatenate(
        [xs.reshape(m, -1), low.reshape(m, -1), hi.reshape(m, -1)], axis=-1)
    feats_ref = (flat_ref @ params["w_feat"]).reshape(B, L, cls_vector_dim)
    ref = _reference_attention(
        feats_ref, params["w_kv"], params["agg"], params["w_out"],
        params["gamma"], params["beta"], params["w_cls"], params["b_cls"],
        num_heads, dim_head)
    assert jnp.allclose(out, ref, atol=2e-2, rtol=2e-2), (out, ref)

    print("KERNEL_OK")
</pallas_src>

<mosaic_0001>
module attributes {stable_mosaic.version = 11 : i64} {
  func.func @_proj_kernel(%arg0: i32, %arg1: i32, %arg2: memref<8x512xbf16, #tpu.memory_space<vmem>>, %arg3: memref<512x32xbf16, #tpu.memory_space<vmem>>, %arg4: memref<8x32xbf16, #tpu.memory_space<vmem>>, %arg5: memref<8x32xf32, #tpu.memory_space<vmem>>) attributes {dimension_semantics = [#tpu.dimension_semantics<parallel>, #tpu.dimension_semantics<arbitrary>], iteration_bounds = array<i64: 1, 5>, scalar_prefetch = 0 : i64, scratch_operands = 1 : i64, tpu.core_type = #tpu.core_type<tc>, window_params = [{transform_indices = @transform_0, window_bounds = array<i64: 8, 512>}, {transform_indices = @transform_1, window_bounds = array<i64: 512, 32>}, {transform_indices = @transform_2, window_bounds = array<i64: 8, 32>}]} {
    %c0_i32 = arith.constant 0 : i32
    %0 = arith.cmpi eq, %arg1, %c0_i32 : i32
    %1 = arith.extui %0 : i1 to i32
    %c0_i32_0 = arith.constant 0 : i32
    %2 = arith.cmpi ne, %1, %c0_i32_0 : i32
    scf.if %2 {
      %cst_9 = arith.constant 0.000000e+00 : f32
      %12 = vector.broadcast %cst_9 : f32 to vector<8x32xf32>
      %c0_10 = arith.constant 0 : index
      %c0_11 = arith.constant 0 : index
      %13 = vector.load %arg5[%c0_10, %c0_11] : memref<8x32xf32, #tpu.memory_space<vmem>>, vector<8x32xf32>
      tpu.vector_store %arg5[%c0_10, %c0_11], %12 {strides = array<i32>} : memref<8x32xf32, #tpu.memory_space<vmem>>, vector<8x32xf32>,
    } else {
    }
    %c0 = arith.constant 0 : index
    %c0_1 = arith.constant 0 : index
    %3 = vector.load %arg5[%c0, %c0_1] : memref<8x32xf32, #tpu.memory_space<vmem>>, vector<8x32xf32>
    %c0_2 = arith.constant 0 : index
    %c0_3 = arith.constant 0 : index
    %4 = vector.load %arg2[%c0_2, %c0_3] : memref<8x512xbf16, #tpu.memory_space<vmem>>, vector<8x512xbf16>
    %c0_4 = arith.constant 0 : index
    %c0_5 = arith.constant 0 : index
    %5 = vector.load %arg3[%c0_4, %c0_5] : memref<512x32xbf16, #tpu.memory_space<vmem>>, vector<512x32xbf16>
    %cst = arith.constant dense<0.000000e+00> : vector<8x32xf32>
    %6 = tpu.matmul %4, %5, %cst {dimension_numbers = #tpu.dot_dimension_numbers<[1], [0], [0], [1], [0, 0, 1, 1], [], []>} : vector<8x512xbf16>, vector<512x32xbf16>, vector<8x32xf32> -> vector<8x32xf32>
    %7 = arith.addf %3, %6 : vector<8x32xf32>
    %c0_6 = arith.constant 0 : index
    %c0_7 = arith.constant 0 : index
    %8 = vector.load %arg5[%c0_6, %c0_7] : memref<8x32xf32, #tpu.memory_space<vmem>>, vector<8x32xf32>
    tpu.vector_store %arg5[%c0_6, %c0_7], %7 {strides = array<i32>} : memref<8x32xf32, #tpu.memory_space<vmem>>, vector<8x32xf32>,
    %c4_i32 = arith.constant 4 : i32
    %9 = arith.cmpi eq, %arg1, %c4_i32 : i32
    %10 = arith.extui %9 : i1 to i32
    %c0_i32_8 = arith.constant 0 : i32
    %11 = arith.cmpi ne, %10, %c0_i32_8 : i32
    scf.if %11 {
      %c0_9 = arith.constant 0 : index
      %c0_10 = arith.constant 0 : index
      %12 = vector.load %arg5[%c0_9, %c0_10] : memref<8x32xf32, #tpu.memory_space<vmem>>, vector<8x32xf32>
      %13 = arith.truncf %12 : vector<8x32xf32> to vector<8x32xbf16>
      %c0_11 = arith.constant 0 : index
      %c0_12 = arith.constant 0 : index
      %14 = vector.load %arg4[%c0_11, %c0_12] : memref<8x32xbf16, #tpu.memory_space<vmem>>, vector<8x32xbf16>
      tpu.vector_store %arg4[%c0_11, %c0_12], %13 {strides = array<i32>} : memref<8x32xbf16, #tpu.memory_space<vmem>>, vector<8x32xbf16>,
    } else {
    }
    return
  }
  func.func @transform_0(%arg0: i32, %arg1: i32) -> (i32, i32) {
    %c0_i32 = arith.constant 0 : i32
    return %arg0, %arg1 : i32, i32
  }
  func.func @transform_1(%arg0: i32, %arg1: i32) -> (i32, i32) {
    %c0_i32 = arith.constant 0 : i32
    %c0_i32_0 = arith.constant 0 : i32
    return %arg1, %c0_i32 : i32, i32
  }
  func.func @transform_2(%arg0: i32, %arg1: i32) -> (i32, i32) {
    %c0_i32 = arith.constant 0 : i32
    %c0_i32_0 = arith.constant 0 : i32
    return %arg0, %c0_i32 : i32, i32
  }
}

</mosaic_0001>

<bundles_post_ra>
// kernel: tpu_custom_call.1
= control target key start
LH: loop header
LB: loop body
LE: loop exit
PB: predicated region body
PF: predicated region fallthrough
CT: control target
= control target key end

     0   :  { %7 = vsyncpa [#allocation4], 0  ;;  %s866_s9 = smov 0   ;;  %s868_s10 = smov 0   ;;  %s972_s0 = inlined_call_operand.vmem [shape: bf16[8,2560], index: 0, kind: input, shape index: {}]   ;;  %s973_s1 = inlined_call_operand.vmem [shape: bf16[2560,32], index: 1, kind: input, shape index: {}]   ;;  %s974_s2 = inlined_call_operand.hbm [shape: bf16[8,32], index: 2, kind: output, shape index: {}]  }
   0x1   :  { %s870_s11 = smov 0  }
   0x2 LB: > { %s633_s12 = sadd.s32 4294967295, %s847_s11   ;;  %s22_s13 = sadd.s32 1, %s843_s10  ;;  %s847_s11 = sphi %s870_s11, %s13_s11   ;;  %s843_s10 = sphi %s868_s10, %s977_s10   ;;  %s839_s9 = sphi %s866_s9, %s976_s9  }
   0x3   : > { %p23_p0 = scmp.ge.s32.totalorder %s22_s13, 5  ;;  %p636_p1 = scmp.ge.s32.totalorder %s847_s11, 1 }
   0x4   : > { %p143_p2 = scmp.lt.s32.totalorder %s847_s11, 6 }
   0x5   : > { %s979_s13 = smov (%p23_p0, %s22_s13), 0 }
   0x6   : > { %p144_p3 = pnand %p636_p1, %p143_p2 }
   0x7   : > { %s637_s14 = sshll.u32 (!%p144_p3), %s839_s9, 2  ;;  %s639_s15 = sshll.u32 (!%p144_p3), %s839_s9, 6 }
   0x8   : > { %147 = sbr.rel (%p144_p3) target bundleno = 315 (0x13b), region = 28  ;;  %p172_p4 = scmp.lt.s32.totalorder (!%p144_p3), %s637_s14, 19 }
   0x9   : > { %p180_p5 = scmp.lt.s32.totalorder (!%p144_p3), %s639_s15, 319  ;;  %p641_p6 = scmp.ne.s32.totalorder (!%p144_p3), %s839_s9, 0 }
   0xf   : > { %s981_s14 = smov (!%p172_p4, %s637_s14), 19  ;;  %s983_s15 = smov (!%p180_p5, %s639_s15), 319 }
  0x10   : > { %s638_s16 = sshll.u32 %s981_s14, 2  ;;  %s640_s20 = sshll.u32 %s983_s15, 2  ;;  %vm190_vm0 = vcmask (!%p641_p6), 261120   ;;  %v849_v0 = vmov (!%p641_p6), 0.0  }
  0x11   : > { %s892_s19 = scalar_lea.vmem %s972_s0, %s638_s16  ;;  %s897_s23 = scalar_lea.vmem %s973_s1, %s640_s20  ;;  %191 = vst.msk [vmem:[#allocation2] sm:$0xff] (!%p641_p6), %vm190_vm0, %v849_v0 }
  0x12   : > { %189 = sbr.rel (%p641_p6) target bundleno = 25 (0x19), region = 32 }
  0x19 PF: > { %v759_v1 = vld [vmem:[%s897_s23 + $0x40] sm:$0xff]   ;;  %v763_v5 = vld [vmem:[%s897_s23 + $0x48] sm:$0xff]   ;;  %v767_v9 = vld [vmem:[%s897_s23 + $0x50] sm:$0xff]   ;;  %vm546_vm1 = vcmask 261120   ;;  %p678_p7 = scmp.ne.s32.totalorder %s839_s9, 4 }
  0x1a   : > { %v760_v2 = vld [vmem:[%s897_s23 + $0xc0] sm:$0xff]   ;;  %683 = vmatprep.subr.bf16.mxu0 %v759_v1  ;;  %v764_v6 = vld [vmem:[%s897_s23 + $0xc8] sm:$0xff]   ;;  %v768_v10 = vld [vmem:[%s897_s23 + $0xd0] sm:$0xff]   ;;  %vm554_vm2 = vcmask (!%p678_p7), 257024  }
  0x1b   : > { %v761_v3 = vld [vmem:[%s897_s23] sm:$0xff]   ;;  %705 = vmatprep.subr.bf16.mxu1 %v760_v2  ;;  %v765_v7 = vld [vmem:[%s897_s23 + $0x8] sm:$0xff]   ;;  %v769_v11 = vld [vmem:[%s897_s23 + $0x10] sm:$0xff]  }
  0x1c   : > { %v762_v4 = vld [vmem:[%s897_s23 + $0x80] sm:$0xff]   ;;  %684 = vmatpush3.bf16.msra.mxu0 %v761_v3  ;;  %v766_v8 = vld [vmem:[%s897_s23 + $0x88] sm:$0xff]   ;;  %v770_v12 = vld [vmem:[%s897_s23 + $0x90] sm:$0xff]  }
  0x1d   : > { %706 = vmatpush3.bf16.msra.mxu1 %v762_v4  ;;  %685 = vmatprep.subr.bf16.mxu0 %v763_v5  ;;  %v771_v13 = vld [vmem:[%s897_s23 + $0x58] sm:$0xff]   ;;  %v775_v17 = vld [vmem:[%s897_s23 + $0x60] sm:$0xff]   ;;  %v779_v21 = vld [vmem:[%s897_s23 + $0x68] sm:$0xff]  }
  0x1e   : > { %707 = vmatprep.subr.bf16.mxu1 %v764_v6  ;;  %v772_v14 = vld [vmem:[%s897_s23 + $0xd8] sm:$0xff]   ;;  %v776_v18 = vld [vmem:[%s897_s23 + $0xe0] sm:$0xff]   ;;  %v780_v22 = vld [vmem:[%s897_s23 + $0xe8] sm:$0xff]  }
  0x1f   : > { %v773_v15 = vld [vmem:[%s897_s23 + $0x18] sm:$0xff]   ;;  %v777_v19 = vld [vmem:[%s897_s23 + $0x20] sm:$0xff]   ;;  %v781_v23 = vld [vmem:[%s897_s23 + $0x28] sm:$0xff]  }
  0x20   : > { %686 = vmatpush3.bf16.msra.mxu0 %v765_v7  ;;  %v774_v16 = vld [vmem:[%s897_s23 + $0x98] sm:$0xff]   ;;  %v778_v20 = vld [vmem:[%s897_s23 + $0xa0] sm:$0xff]   ;;  %v782_v24 = vld [vmem:[%s897_s23 + $0xa8] sm:$0xff]  }
  0x21   : > { %708 = vmatpush3.bf16.msra.mxu1 %v766_v8  ;;  %687 = vmatprep.subr.bf16.mxu0 %v767_v9  ;;  %v783_v25 = vld [vmem:[%s897_s23 + $0x70] sm:$0xff]   ;;  %v787_v29 = vld [vmem:[%s897_s23 + $0x78] sm:$0xff]   ;;  %v193_v33 = vld [vmem:[%s892_s19] sm:$0xff] }
  0x22   : > { %709 = vmatprep.subr.bf16.mxu1 %v768_v10  ;;  %v784_v26 = vld [vmem:[%s897_s23 + $0xf0] sm:$0xff]   ;;  %v788_v30 = vld [vmem:[%s897_s23 + $0xf8] sm:$0xff]   ;;  %v194_v34 = vld [vmem:[%s892_s19 + $0x8] sm:$0xff]  ;;  %v642_v35 = vcombine.low %v193_v33, %v193_v33  ;;  %v643_v36 = vcombine.high %v193_v33, %v193_v33 }
  0x23   : > { %v785_v27 = vld [vmem:[%s897_s23 + $0x30] sm:$0xff]   ;;  %v789_v31 = vld [vmem:[%s897_s23 + $0x38] sm:$0xff]   ;;  %v644_v37 = vcombine.low %v194_v34, %v194_v34  ;;  %v645_v38 = vcombine.high %v194_v34, %v194_v34  ;;  %v192_v47 = vld [vmem:[#allocation2] sm:$0xff] }
  0x24   : > { %688 = vmatpush3.bf16.msra.mxu0 %v769_v11  ;;  %v786_v28 = vld [vmem:[%s897_s23 + $0xb0] sm:$0xff]   ;;  %v790_v32 = vld [vmem:[%s897_s23 + $0xb8] sm:$0xff]   ;;  %497 = vmatprep.mubr.bf16.mxu0 %v643_v36 }
  0x25   : > { %710 = vmatpush3.bf16.msra.mxu1 %v770_v12  ;;  %689 = vmatprep.subr.bf16.mxu0 %v771_v13 }
  0x26   : > { %711 = vmatprep.subr.bf16.mxu1 %v772_v14  ;;  %537 = vmatprep.mubr.bf16.mxu1 %v645_v38 }
  0x28   : > { %690 = vmatpush3.bf16.msra.mxu0 %v773_v15 }
  0x29   : > { %712 = vmatpush3.bf16.msra.mxu1 %v774_v16  ;;  %691 = vmatprep.subr.bf16.mxu0 %v775_v17 }
  0x2a   : > { %713 = vmatprep.subr.bf16.mxu1 %v776_v18 }
  0x2c   : > { %692 = vmatpush3.bf16.msra.mxu0 %v777_v19 }
  0x2d   : > { %714 = vmatpush3.bf16.msra.mxu1 %v778_v20  ;;  %693 = vmatprep.subr.bf16.mxu0 %v779_v21 }
  0x2e   : > { %715 = vmatprep.subr.bf16.mxu1 %v780_v22 }
  0x30   : > { %694 = vmatpush3.bf16.msra.mxu0 %v781_v23 }
  0x31   : > { %716 = vmatpush3.bf16.msra.mxu1 %v782_v24  ;;  %695 = vmatprep.subr.bf16.mxu0 %v783_v25 }
  0x32   : > { %717 = vmatprep.subr.bf16.mxu1 %v784_v26 }
  0x34   : > { %696 = vmatpush3.bf16.msra.mxu0 %v785_v27 }
  0x35   : > { %718 = vmatpush3.bf16.msra.mxu1 %v786_v28  ;;  %697 = vmatprep.subr.bf16.mxu0 %v787_v29 }
  0x36   : > { %719 = vmatprep.subr.bf16.mxu1 %v788_v30 }
  0x38   : > { %698 = vmatpush3.bf16.msra.mxu0 %v789_v31 }
  0x39   : > { %720 = vmatpush3.bf16.msra.mxu1 %v790_v32 }
  0x3b   : > { %498 = vmatmul.mubr.bf16.vlgmr.msra.gmra.mrb[0].mxu0 %v642_v35 }
  0x3c   : > { %538 = vmatmul.mubr.bf16.vlgmr.msra.gmra.mrb[0].mxu1 %v644_v37 }
 0x10e   : > { %v699_v39 = vpop.f32.mrb[0].mxu0 }
 0x10f   : > { %v721_v40 = vpop.f32.mrb[0].mxu1  ;;  %v700_v41 = vpop.f32.mrb[1].mxu0 }
 0x110   : > { %v722_v42 = vpop.f32.mrb[1].mxu1  ;;  %v701_v43 = vadd.f32 %v700_v41, %v699_v39  ;;  %v702_v45 = vpop.f32.mrb[2].mxu0 }
 0x111   : > { %v723_v44 = vadd.f32 %v722_v42, %v721_v40  ;;  %v724_v46 = vpop.f32.mrb[2].mxu1  ;;  %v703_v48 = vpop.f32.mrb[3].mxu0  ;;  %551 = sbr.rel (%p678_p7) target bundleno = 290 (0x122), region = 36 }
 0x112   : > { %v725_v49 = vpop.f32.mrb[3].mxu1 }
 0x113   : > { %v540_v50 = vadd.f32 %v723_v44, %v701_v43 }
 0x115   : > { %v545_v51 = vadd.f32 %v540_v50, %v192_v47 }
 0x117   : > { %547 = vst.msk [vmem:[#allocation2] sm:$0xff] %vm546_vm1, %v545_v51 }
 0x11e   : > { %v552_v52 = vld [vmem:[#allocation2] sm:$0xff] }
 0x11f   : > { %v553_v53 = vpack.c.bf16 %v552_v52, %v552_v52 }
 0x121   : > { %555 = vst.msk [vmem:[#allocation3] sm:$0xf] %vm554_vm2, %v553_v53 }
 0x122 PF: > { %p937_p8 = scmp.eq.s32.totalorder %s633_s12, 4  ;;  %s850_s25 = smov [#allocation3]  }
 0x123   : > { %s565_s26 = sshll.u32 %s850_s25, 4  ;;  %s566_s26 = int_to_ptr.vmem [resolvable:$true] %s565_s26 }
 0x124   : > { %s795_s27 = scalar_lea.vmem %s566_s26, 64  ;;  %p802_p12 = scmp.lt.s32.totalorder %s566_s26, %s566_s26 }
 0x125   : > { %p796_p9 = scmp.ne.s32.totalorder %s566_s26, %s795_s27  ;;  %p803_p13 = scmp.lt.s32.totalorder %s795_s27, %s795_s27 }
 0x127   : > { %p797_p10 = pnand %p796_p9, %p937_p8  ;;  %p804_p0 = por %p803_p13, %p802_p12 }
 0x129   : > { %p798_p11 = pneg %p797_p10 }
 0x12b   : > { %p805_p1 = pnand %p804_p0, %p798_p11 }
 0x12d   : > { %808 = shalt.err (!%p805_p1)
}
 0x12e   : > { %s809_s30 = scalar_lea.hbm %s974_s2, 64 }
 0x12f   : > { %p810_p2 = scmp.ne.s32.totalorder %s974_s2, %s809_s30  ;;  %p815_p5 = scmp.lt.u32.totalorder %s809_s30, %s974_s2 }
 0x131   : > { %p811_p3 = pnand %p810_p2, %p937_p8 }
 0x133   : > { %p812_p4 = pneg %p811_p3 }
 0x135   : > { %p817_p6 = pnand %p815_p5, %p812_p4 }
 0x137   : > { %820 = shalt.err (!%p817_p6)
}
 0x138   : > { %728 = dma.vmem_to_hbm [thread:$0]  (%p937_p8), %s566_s26, 64, %s974_s2, [#allocation4]  }
 0x139   : > { %834 = dma.done.wait (%p937_p8), [#allocation4], 64  }
 0x13a   : > { %836 = vsyncadd (%p937_p8), [#allocation4], 4294967232 }
 0x13b PF: > { %s13_s11 = sadd.s32 1, %s847_s11   ;;  %s976_s9 = smov %s843_s10 }
 0x13c   : > { %p10_p7 = scmp.ge.s32.totalorder %s13_s11, 7   ;;  %s977_s10 = smov %s979_s13 }
 0x13e   :  { %12 = sbr.rel (!%p10_p7) target bundleno = 2 (0x2), region = 67 }
 0x145   :  { %578 = vsyncpa [#allocation4], 1 }
 0x146   :  { %580 = vsyncpa [#allocation4 + $0x1], 1 }

</bundles_post_ra>
